<compile_context>
chip_gen: v6e
topology: v6e:2x2x1
jax: 0.10.0
libtpu: 0.0.40
codegen_flags: <defaults>
</compile_context>

<pallas_src>
import jax
import jax.numpy as jnp
from jax.experimental import pallas as pl
from jax.experimental.pallas import tpu as pltpu

_LANES = 128  # TPU vreg lane width


def _identity_kernel(x_ref, o_ref):
    # Pure pass-through: the hot path of an identity forward.
    o_ref[...] = x_ref[...]


def _vmem_capacity_bytes() -> int:
    """Trace-time query of this chip's VMEM capacity (with a safe fallback)."""
    try:
        return int(pltpu.get_tpu_info().vmem_capacity_bytes)
    except Exception:
        return 64 * 1024 * 1024  # conservative default (v7x per-TC VMEM)


def _choose_tile_rows(rows: int, bytes_per_row: int, vmem_cap: int) -> int:
    """Pick a tile row count for a (rows, 128)-shaped lane-dense slab.

    Budget: in + out BlockSpecs, each double-buffered -> 4 live buffers, so a
    per-buffer budget of vmem_cap/16 leaves ample headroom (8 MiB on v5e/v6e,
    4 MiB on v7x).  Also cap so large inputs keep >= ~8 grid steps for v7x
    megacore sharding and DMA/compute overlap.  Row counts are kept multiples
    of 8 to satisfy the (8, 128) block-shape constraint.
    """
    budget_rows = max((vmem_cap // 16) // max(bytes_per_row, 1), 8)
    budget_rows = (budget_rows // 8) * 8
    # Aim for at least ~8 grid steps when the input is large enough.
    target_rows = ((pl.cdiv(rows, 8) + 7) // 8) * 8
    tile = min(budget_rows, max(target_rows, 8))
    if tile >= rows:
        return rows  # single full-extent block (allowed by the tiling rules)
    return tile


def _identity_copy_2d(x2d: jax.Array) -> jax.Array:
    """Tiled, lane-dense identity copy of a (rows, 128) slab."""
    rows, cols = x2d.shape
    itemsize = jnp.dtype(x2d.dtype).itemsize
    vmem_cap = _vmem_capacity_bytes()
    tile_rows = _choose_tile_rows(rows, cols * itemsize, vmem_cap)
    grid = (pl.cdiv(rows, tile_rows),)
    nbytes = rows * cols * itemsize

    return pl.pallas_call(
        _identity_kernel,
        out_shape=jax.ShapeDtypeStruct((rows, cols), x2d.dtype),
        grid=grid,
        in_specs=[pl.BlockSpec((tile_rows, cols), lambda i: (i, 0))],
        out_specs=pl.BlockSpec((tile_rows, cols), lambda i: (i, 0)),
        # Purely mem-bound: 1 read + 1 write of the whole slab.
        cost_estimate=pl.CostEstimate(
            flops=0, transcendentals=0, bytes_accessed=2 * nbytes),
        compiler_params=pltpu.CompilerParams(
            dimension_semantics=("parallel",),
            vmem_limit_bytes=min(vmem_cap // 2, 64 * 1024 * 1024),
        ),
    )(x2d)


@jax.jit
def predictor_forward(x: jax.Array) -> jax.Array:
    """Identity forward of the (abstract) Predictor, as a Pallas kernel.

    Accepts a tensor of any shape (e.g. NCHW), returns an identical tensor.
    """
    if x.size == 0:
        return x  # nothing to copy

    flat = x.reshape(-1)
    total = flat.size
    pad = (-total) % _LANES  # static (shape-derived) at trace time
    if pad:
        # Lane-dense fallback: pad to a multiple of 128 lanes, copy, slice back.
        flat = jnp.pad(flat, (0, pad))

    x2d = flat.reshape(-1, _LANES)
    out2d = _identity_copy_2d(x2d)
    out = out2d.reshape(-1)
    if pad:
        out = out[:total]
    return out.reshape(x.shape)


if __name__ == "__main__":
    key = jax.random.PRNGKey(0)
    # Small NCHW input consistent with a typical Predictor forward signature.
    x = jax.random.normal(key, (2, 4, 16, 16), dtype=jnp.float32)

    y = predictor_forward(x)
    jax.block_until_ready(y)

    # Sanity check: identity semantics (the only defined behavior).
    assert y.shape == x.shape and y.dtype == x.dtype
    assert bool(jnp.allclose(y, x))

    print("KERNEL_OK")
</pallas_src>

<mosaic_0001>
module attributes {stable_mosaic.version = 11 : i64} {
  func.func @_identity_kernel(%arg0: i32, %arg1: memref<8x128xf32, #tpu.memory_space<vmem>>, %arg2: memref<8x128xf32, #tpu.memory_space<vmem>>) attributes {dimension_semantics = [#tpu.dimension_semantics<parallel>], iteration_bounds = array<i64: 2>, scalar_prefetch = 0 : i64, scratch_operands = 0 : i64, tpu.core_type = #tpu.core_type<tc>, window_params = [{transform_indices = @transform_0, window_bounds = array<i64: 8, 128>}, {transform_indices = @transform_1, window_bounds = array<i64: 8, 128>}]} {
    %c0 = arith.constant 0 : index
    %c0_0 = arith.constant 0 : index
    %0 = vector.load %arg1[%c0, %c0_0] : memref<8x128xf32, #tpu.memory_space<vmem>>, vector<8x128xf32>
    %c0_1 = arith.constant 0 : index
    %c0_2 = arith.constant 0 : index
    %1 = vector.load %arg2[%c0_1, %c0_2] : memref<8x128xf32, #tpu.memory_space<vmem>>, vector<8x128xf32>
    tpu.vector_store %arg2[%c0_1, %c0_2], %0 {strides = array<i32>} : memref<8x128xf32, #tpu.memory_space<vmem>>, vector<8x128xf32>,
    return
  }
  func.func @transform_0(%arg0: i32) -> (i32, i32) {
    %c0_i32 = arith.constant 0 : i32
    %c0_i32_0 = arith.constant 0 : i32
    return %arg0, %c0_i32 : i32, i32
  }
  func.func @transform_1(%arg0: i32) -> (i32, i32) {
    %c0_i32 = arith.constant 0 : i32
    %c0_i32_0 = arith.constant 0 : i32
    return %arg0, %c0_i32 : i32, i32
  }
}

</mosaic_0001>

<bundles_post_ra>
// kernel: predictor_forward.1
= control target key start
LH: loop header
LB: loop body
LE: loop exit
PB: predicated region body
PF: predicated region fallthrough
CT: control target
= control target key end

     0   :  { %s188_s6 = smov 0   ;;  %s208_s0 = inlined_call_operand.vmem [shape: f32[16,128], index: 0, kind: input, shape index: {}]   ;;  %s209_s1 = inlined_call_operand.vmem [shape: f32[16,128], index: 1, kind: output, shape index: {}]  }
   0x1 LB: > { %s167_s7 = sadd.s32 4294967295, %s190_s6   ;;  %p171_p0 = scmp.ge.s32.totalorder %s190_s6, 1  ;;  %s190_s6 = sphi %s188_s6, %s11_s6  }
   0x2   : > { %p86_p1 = scmp.lt.s32.totalorder %s190_s6, 3 }
   0x4   : > { %p87_p2 = pnand %p171_p0, %p86_p1 }
   0x5   : > { %p104_p3 = scmp.lt.s32.totalorder (!%p87_p2), %s167_s7, 1 }
   0x6   : > { %90 = sbr.rel (%p87_p2) target bundleno = 16 (0x10), region = 24 }
   0xb   : > { %s211_s7 = smov (!%p104_p3, %s167_s7), 1 }
   0xc   : > { %s172_s8 = sshll.u32 %s211_s7, 3 }
   0xd   : > { %s107_s11 = scalar_lea.vmem %s208_s0, %s172_s8  ;;  %s111_s14 = scalar_lea.vmem %s209_s1, %s172_s8 }
   0xe   : > { %v112_v0 = vld [vmem:[%s107_s11] sm:$0xff] }
   0xf   : > { %113 = vst [vmem:[%s111_s14] sm:$0xff] %v112_v0 }
  0x10 PF: > { %s11_s6 = sadd.s32 1, %s190_s6  }
  0x11   : > { %p8_p4 = scmp.ge.s32.totalorder %s11_s6, 4  }
  0x13   :  { %10 = sbr.rel (!%p8_p4) target bundleno = 1 (0x1), region = 54 }

</bundles_post_ra>
